<compile_context>
chip_gen: v7x
topology: tpu7x:2x2x1
jax: 0.10.0
libtpu: 0.0.40
codegen_flags: <defaults>
</compile_context>

<pallas_src>
import functools

import numpy as np
import jax
import jax.numpy as jnp
from jax.experimental import pallas as pl
from jax.experimental.pallas import tpu as pltpu

_BN_EPS = 1e-5
_LANE = 128


def _round_up(x, m):
    return -(-x // m) * m


# ----------------------------------------------------------------------------
# Fused Pallas kernel: whole ResNeXt block for one (TM, 128) row block.
# TM % H == 0, so every block contains whole images and the kh-tap masks only
# need the local row index mod H.  Intermediates live in vregs; HBM traffic is
# exactly: x in, out out, weights once.
# ----------------------------------------------------------------------------
def _resnext_fused_kernel(x_ref, w1_ref, b1_ref, w2_ref, b2_ref, w3_ref, b3_ref,
                          o_ref, *, H):
    x = x_ref[...]                                                  # (TM, 128) f32

    # conv1x1 #1 (+ folded BN1 scale) + bias + ReLU.  Output columns include the
    # zero w-pad blocks (weights and bias are zero there -> relu(0) = 0).
    y1 = jnp.dot(x.astype(jnp.bfloat16), w1_ref[...],
                 preferred_element_type=jnp.float32)
    y1 = jnp.maximum(y1 + b1_ref[...], 0.0)                         # (TM, N1)

    # grouped 3x3 conv (+ folded BN2 scale) + bias + ReLU.
    # kw taps + per-group channel mix are baked into w2[kh]; the kh taps are
    # shifted copies of y1 built with XLU sublane rolls, masked at image
    # boundaries (rows above row 0 / below row H-1 of each image are the conv's
    # zero padding).  Wrapped rows from the roll are exactly the masked rows.
    TM = x.shape[0]
    row = jax.lax.broadcasted_iota(jnp.int32, (TM, 1), 0) % H
    up = jnp.where(row == 0, 0.0, pltpu.roll(y1, shift=1, axis=0))          # y1[r-1]
    dn = jnp.where(row == H - 1, 0.0, pltpu.roll(y1, shift=TM - 1, axis=0))  # y1[r+1]
    # Back-to-back accumulation chain (MRB-friendly on v7x).
    acc = jnp.dot(up.astype(jnp.bfloat16), w2_ref[0],
                  preferred_element_type=jnp.float32)
    acc += jnp.dot(y1.astype(jnp.bfloat16), w2_ref[1],
                   preferred_element_type=jnp.float32)
    acc += jnp.dot(dn.astype(jnp.bfloat16), w2_ref[2],
                   preferred_element_type=jnp.float32)
    y2 = jnp.maximum(acc + b2_ref[...], 0.0)                        # (TM, N2)

    # conv1x1 expand (+ folded BN3 scale) + bias + identity residual + ReLU,
    # lane-dense (128-wide) output store.
    y3 = jnp.dot(y2.astype(jnp.bfloat16), w3_ref[...],
                 preferred_element_type=jnp.float32)
    o_ref[...] = jnp.maximum(y3 + b3_ref[...] + x, 0.0)


# ----------------------------------------------------------------------------
# Pallas wrappers
# ----------------------------------------------------------------------------
def resnext_block_forward_folded(x_rows, kp):
    """x_rows: (R, W*Cin) folded NHWC rows, R a multiple of kp['TM'].

    This is the measured/production path (no layout transposes around the call).
    """
    R, K1 = x_rows.shape
    TM = kp["TM"]
    assert K1 == kp["K1"] and R % TM == 0

    kernel = functools.partial(_resnext_fused_kernel, H=kp["H"])
    # Grid-invariant operands: whole-array VMEM residency, no double-buffering.
    wspec = pl.BlockSpec(memory_space=pltpu.MemorySpace.VMEM)

    return pl.pallas_call(
        kernel,
        out_shape=jax.ShapeDtypeStruct((R, kp["N3"]), jnp.float32),
        grid_spec=pltpu.PrefetchScalarGridSpec(
            num_scalar_prefetch=0,
            grid=(R // TM,),
            in_specs=[
                pl.BlockSpec((TM, K1), lambda i: (i, 0)),   # x row block
                wspec,  # W1 (bf16)
                wspec,  # b1 (f32)
                wspec,  # W2 (bf16, 3 kh taps)
                wspec,  # b2
                wspec,  # W3 (bf16)
                wspec,  # b3
            ],
            out_specs=pl.BlockSpec((TM, kp["N3"]), lambda i: (i, 0)),
        ),
        compiler_params=pltpu.CompilerParams(
            dimension_semantics=("parallel",),   # row blocks independent -> megacore
            vmem_limit_bytes=32 * 1024 * 1024,   # ample; re-derive if TM grows (v7x: 64 MiB)
        ),
    )(x_rows, kp["W1"], kp["b1"], kp["W2"], kp["b2"], kp["W3"], kp["b3"])


def resnext_block_forward(x_nchw, kp):
    """NCHW wrapper matching the PyTorch module interface.

    The NCHW<->folded-NHWC transposes are host-side XLA; production callers
    should stay in the folded layout and call resnext_block_forward_folded.
    """
    N, Cin, H, W = x_nchw.shape
    assert H == kp["H"] and W == kp["W"] and Cin == kp["Cin"]
    x_rows = jnp.transpose(x_nchw, (0, 2, 3, 1)).reshape(N * H, W * Cin)
    R = N * H
    Rp = _round_up(R, kp["TM"])
    if Rp != R:
        # Zero-pad rows; pad rows never leak into valid rows (TM % H == 0 and the
        # kh-tap masks zero the taps at every image boundary).
        x_rows = jnp.pad(x_rows, ((0, Rp - R), (0, 0)))
    out_rows = resnext_block_forward_folded(x_rows, kp)
    out = out_rows[:R].reshape(N, H, W, kp["Cexp"])
    return jnp.transpose(out, (0, 3, 1, 2))


# ----------------------------------------------------------------------------
# Parameter setup (host-side glue)
# ----------------------------------------------------------------------------
def init_params(key, in_channels, out_channels, expand, cardinality):
    ks = jax.random.split(key, 6)
    Cg = out_channels // cardinality
    Cexp = out_channels * expand

    w1_pt = 0.1 * jax.random.normal(ks[0], (out_channels, in_channels, 1, 1), jnp.float32)
    w2_pt = 0.1 * jax.random.normal(ks[1], (out_channels, Cg, 3, 3), jnp.float32)
    w3_pt = 0.1 * jax.random.normal(ks[2], (Cexp, out_channels, 1, 1), jnp.float32)

    def bn_params(k, C):
        k1, k2, k3, k4 = jax.random.split(k, 4)
        gamma = 1.0 + 0.1 * jax.random.normal(k1, (C,), jnp.float32)
        beta = 0.1 * jax.random.normal(k2, (C,), jnp.float32)
        mean = 0.1 * jax.random.normal(k3, (C,), jnp.float32)
        var = jnp.abs(jax.random.normal(k4, (C,), jnp.float32)) + 0.5
        return (gamma, beta, mean, var)

    return {
        "w1_pt": w1_pt, "w2_pt": w2_pt, "w3_pt": w3_pt,
        "bn1": bn_params(ks[3], out_channels),
        "bn2": bn_params(ks[4], out_channels),
        "bn3": bn_params(ks[5], Cexp),
        "cardinality": cardinality,
    }


def fold_params_for_kernel(params, H, W):
    """One-time host-side prep.

    Folds inference-mode BN scales into the matmul weights (biases kept
    separate), folds the image width into the lane axis (block-diagonal over w),
    bakes the 3x3 conv's kw taps + per-group channel mix into one matrix per kh
    tap, and zero-pads every intermediate width up to a multiple of 128 lanes.
    Weights are cast to bf16 for the MXU; biases stay f32.
    """
    card = params["cardinality"]
    w1 = np.asarray(params["w1_pt"])[:, :, 0, 0]          # (Cmid, Cin)
    w2 = np.asarray(params["w2_pt"])                      # (Cmid, Cg, 3, 3)
    w3 = np.asarray(params["w3_pt"])[:, :, 0, 0]          # (Cexp, Cmid)
    Cmid, Cin = w1.shape
    Cexp = w3.shape[0]
    Cg = Cmid // card
    Wp = W + 2

    assert Cexp == Cin, "identity residual requires out_channels*expand == in_channels"
    assert (W * Cin) % _LANE == 0 and (W * Cexp) % _LANE == 0, \
        "demo regime assumes lane-dense folded input/output widths"

    def fold_bn(bn):
        g, b, m, v = [np.asarray(a, np.float32) for a in bn]
        s = g / np.sqrt(v + _BN_EPS)
        return s.astype(np.float32), (b - m * s).astype(np.float32)

    s1, b1 = fold_bn(params["bn1"])
    s2, b2 = fold_bn(params["bn2"])
    s3, b3 = fold_bn(params["bn3"])

    K1 = W * Cin
    N1 = _round_up(Wp * Cmid, _LANE)   # y1 width (incl. w-pad blocks), lane-dense
    N2 = _round_up(W * Cmid, _LANE)    # y2 width, lane-dense
    N3 = W * Cexp                      # output width (=128 at demo shapes)

    # Row block size: multiple of H (whole images per block) and of 8 sublanes,
    # targeting 128 MXU rows per step.
    TM = (128 // H) * H if H <= 128 else H
    assert TM % 8 == 0 and TM % H == 0

    # conv1x1 #1: (W*Cin) -> (N1); w-pad / lane-pad columns stay zero (bias too).
    W1 = np.zeros((K1, N1), np.float32)
    b1f = np.zeros((1, N1), np.float32)
    for w in range(W):
        W1[w * Cin:(w + 1) * Cin, (w + 1) * Cmid:(w + 2) * Cmid] = w1.T * s1[None, :]
        b1f[0, (w + 1) * Cmid:(w + 2) * Cmid] = b1

    # grouped 3x3 conv: one (N1, N2) matrix per kh tap; kw shift, per-group
    # block-diagonal channel mix and BN2 scale baked in.
    W2 = np.zeros((3, N1, N2), np.float32)
    for kh in range(3):
        for kw in range(3):
            for w in range(W):
                r0 = (w + kw) * Cmid          # padded-width input block
                c0 = w * Cmid                 # output block
                for g in range(card):
                    blk = w2[g * Cg:(g + 1) * Cg, :, kh, kw].T    # (Cg_in, Cg_out)
                    blk = blk * s2[None, g * Cg:(g + 1) * Cg]
                    W2[kh, r0 + g * Cg:r0 + (g + 1) * Cg,
                           c0 + g * Cg:c0 + (g + 1) * Cg] = blk
    b2f = np.zeros((1, N2), np.float32)
    b2f[0, :W * Cmid] = np.tile(b2, W)

    # conv1x1 expand: (N2) -> (W*Cexp), block-diagonal over w, BN3 scale folded.
    W3 = np.zeros((N2, N3), np.float32)
    for w in range(W):
        W3[w * Cmid:(w + 1) * Cmid, w * Cexp:(w + 1) * Cexp] = w3.T * s3[None, :]
    b3f = np.tile(b3, W)[None, :].astype(np.float32)

    return {
        "W1": jnp.asarray(W1, jnp.bfloat16), "b1": jnp.asarray(b1f),
        "W2": jnp.asarray(W2, jnp.bfloat16), "b2": jnp.asarray(b2f),
        "W3": jnp.asarray(W3, jnp.bfloat16), "b3": jnp.asarray(b3f),
        "Cin": Cin, "Cmid": Cmid, "Cexp": Cexp,
        "H": H, "W": W, "K1": K1, "N1": N1, "N2": N2, "N3": N3, "TM": TM,
    }


# ----------------------------------------------------------------------------
# Pure-JAX reference (matches the PyTorch module in eval mode)
# ----------------------------------------------------------------------------
def resnext_block_reference(x_nchw, params):
    def conv(x, w, groups=1, pad=0):
        return jax.lax.conv_general_dilated(
            x, w, (1, 1), [(pad, pad), (pad, pad)],
            dimension_numbers=("NCHW", "OIHW", "NCHW"),
            feature_group_count=groups)

    def bn(x, bnp):
        gamma, beta, mean, var = bnp
        s = gamma / jnp.sqrt(var + _BN_EPS)
        return x * s[None, :, None, None] + (beta - mean * s)[None, :, None, None]

    y = jax.nn.relu(bn(conv(x_nchw, params["w1_pt"]), params["bn1"]))
    y = jax.nn.relu(bn(conv(y, params["w2_pt"], groups=params["cardinality"], pad=1),
                       params["bn2"]))
    y = bn(conv(y, params["w3_pt"]), params["bn3"])
    return jax.nn.relu(y + x_nchw)


# ----------------------------------------------------------------------------
if __name__ == "__main__":
    key = jax.random.PRNGKey(0)
    k_x, k_p = jax.random.split(key)

    # Small shapes consistent with the module: in_channels = out_channels*expand
    # (identity residual); W*Cin = W*Cexp = 128 -> lane-dense folded layout;
    # N*H = 256 rows -> grid of two 128-row MXU-filling blocks.
    N, Cin, H, W = 32, 16, 8, 8
    out_channels, expand, cardinality = 8, 2, 4

    x = jax.random.normal(k_x, (N, Cin, H, W), jnp.float32)
    params = init_params(k_p, Cin, out_channels, expand, cardinality)
    kp = fold_params_for_kernel(params, H, W)

    fwd = jax.jit(lambda xx: resnext_block_forward(xx, kp))
    out = jax.block_until_ready(fwd(x))

    ref = resnext_block_reference(x, params)
    err = float(jnp.max(jnp.abs(out - ref)))
    scale = float(jnp.max(jnp.abs(ref)))
    assert out.shape == (N, Cin, H, W), out.shape
    # bf16 MXU operands (f32 accumulation) -> tolerance loosened vs. pure-f32.
    assert err <= 5e-2 * max(scale, 1.0), f"mismatch vs reference: err={err}, scale={scale}"

    print("KERNEL_OK")
</pallas_src>

<mosaic_0001>
module attributes {stable_mosaic.version = 11 : i64} {
  func.func @_resnext_fused_kernel(%arg0: i32, %arg1: memref<128x128xf32, #tpu.memory_space<vmem>>, %arg2: memref<128x128xbf16, #tpu.memory_space<vmem>>, %arg3: memref<1x128xf32, #tpu.memory_space<vmem>>, %arg4: memref<3x128x128xbf16, #tpu.memory_space<vmem>>, %arg5: memref<1x128xf32, #tpu.memory_space<vmem>>, %arg6: memref<128x128xbf16, #tpu.memory_space<vmem>>, %arg7: memref<1x128xf32, #tpu.memory_space<vmem>>, %arg8: memref<128x128xf32, #tpu.memory_space<vmem>>) attributes {dimension_semantics = [#tpu.dimension_semantics<parallel>], iteration_bounds = array<i64: 2>, scalar_prefetch = 0 : i64, scratch_operands = 0 : i64, tpu.core_type = #tpu.core_type<tc>, window_params = [{transform_indices = @transform_0, window_bounds = array<i64: 128, 128>}, {pipeline_mode = #tpu.pipeline_mode<synchronous>, transform_indices = @transform_1, window_bounds = array<i64: 128, 128>}, {pipeline_mode = #tpu.pipeline_mode<synchronous>, transform_indices = @transform_2, window_bounds = array<i64: 1, 128>}, {pipeline_mode = #tpu.pipeline_mode<synchronous>, transform_indices = @transform_3, window_bounds = array<i64: 3, 128, 128>}, {pipeline_mode = #tpu.pipeline_mode<synchronous>, transform_indices = @transform_4, window_bounds = array<i64: 1, 128>}, {pipeline_mode = #tpu.pipeline_mode<synchronous>, transform_indices = @transform_5, window_bounds = array<i64: 128, 128>}, {pipeline_mode = #tpu.pipeline_mode<synchronous>, transform_indices = @transform_6, window_bounds = array<i64: 1, 128>}, {transform_indices = @transform_7, window_bounds = array<i64: 128, 128>}]} {
    %c0 = arith.constant 0 : index
    %c0_0 = arith.constant 0 : index
    %0 = vector.load %arg1[%c0, %c0_0] : memref<128x128xf32, #tpu.memory_space<vmem>>, vector<128x128xf32>
    %1 = arith.truncf %0 : vector<128x128xf32> to vector<128x128xbf16>
    %c0_1 = arith.constant 0 : index
    %c0_2 = arith.constant 0 : index
    %2 = vector.load %arg2[%c0_1, %c0_2] : memref<128x128xbf16, #tpu.memory_space<vmem>>, vector<128x128xbf16>
    %cst = arith.constant dense<0.000000e+00> : vector<128x128xf32>
    %3 = tpu.matmul %1, %2, %cst {dimension_numbers = #tpu.dot_dimension_numbers<[1], [0], [0], [1], [0, 0, 1, 1], [], []>} : vector<128x128xbf16>, vector<128x128xbf16>, vector<128x128xf32> -> vector<128x128xf32>
    %c0_3 = arith.constant 0 : index
    %c0_4 = arith.constant 0 : index
    %4 = vector.load %arg3[%c0_3, %c0_4] : memref<1x128xf32, #tpu.memory_space<vmem>>, vector<1x128xf32>
    %5 = vector.broadcast %4 : vector<1x128xf32> to vector<128x128xf32>
    %6 = arith.addf %3, %5 : vector<128x128xf32>
    %cst_5 = arith.constant 0.000000e+00 : f32
    %7 = vector.broadcast %cst_5 : f32 to vector<128x128xf32>
    %8 = arith.maximumf %6, %7 : vector<128x128xf32>
    %9 = tpu.iota {dimensions = array<i32: 0>} : vector<128x1xi32>
    %c8_i32 = arith.constant 8 : i32
    %c0_i32 = arith.constant 0 : i32
    %10 = arith.cmpi eq, %c8_i32, %c0_i32 : i32
    %c1_i32 = arith.constant 1 : i32
    %11 = arith.select %10, %c1_i32, %c8_i32 : i32
    %12 = vector.broadcast %11 : i32 to vector<128x1xi32>
    %13 = arith.remsi %9, %12 : vector<128x1xi32>
    %c0_i32_6 = arith.constant 0 : i32
    %14 = vector.broadcast %c0_i32_6 : i32 to vector<128x1xi32>
    %15 = arith.cmpi ne, %13, %14 : vector<128x1xi32>
    %c0_i32_7 = arith.constant 0 : i32
    %16 = vector.broadcast %c0_i32_7 : i32 to vector<128x1xi32>
    %17 = arith.cmpi slt, %13, %16 : vector<128x1xi32>
    %c0_i32_8 = arith.constant 0 : i32
    %18 = arith.cmpi slt, %11, %c0_i32_8 : i32
    %19 = vector.broadcast %18 : i1 to vector<128x1xi1>
    %20 = vector.broadcast %19 : vector<128x1xi1> to vector<128x1xi1>
    %21 = arith.xori %17, %20 : vector<128x1xi1>
    %22 = arith.andi %21, %15 : vector<128x1xi1>
    %23 = vector.broadcast %11 : i32 to vector<128x1xi32>
    %24 = arith.addi %13, %23 : vector<128x1xi32>
    %25 = arith.select %22, %24, %13 : vector<128x1xi1>, vector<128x1xi32>
    %c0_i32_9 = arith.constant 0 : i32
    %26 = vector.broadcast %c0_i32_9 : i32 to vector<128x1xi32>
    %27 = arith.cmpi eq, %25, %26 : vector<128x1xi32>
    %c1_i32_10 = arith.constant 1 : i32
    %28 = tpu.dynamic_rotate %8 by %c1_i32_10 dim 0 : vector<128x128xf32>, i32 -> vector<128x128xf32>
    %cst_11 = arith.constant 0.000000e+00 : f32
    %29 = vector.shape_cast %27 : vector<128x1xi1> to vector<128x1xi1>
    %30 = vector.broadcast %29 : vector<128x1xi1> to vector<128x128xi1>
    %31 = vector.broadcast %cst_11 : f32 to vector<128x128xf32>
    %32 = arith.select %30, %31, %28 : vector<128x128xi1>, vector<128x128xf32>
    %c7_i32 = arith.constant 7 : i32
    %33 = vector.broadcast %c7_i32 : i32 to vector<128x1xi32>
    %34 = arith.cmpi eq, %25, %33 : vector<128x1xi32>
    %c127_i32 = arith.constant 127 : i32
    %35 = tpu.dynamic_rotate %8 by %c127_i32 dim 0 : vector<128x128xf32>, i32 -> vector<128x128xf32>
    %cst_12 = arith.constant 0.000000e+00 : f32
    %36 = vector.shape_cast %34 : vector<128x1xi1> to vector<128x1xi1>
    %37 = vector.broadcast %36 : vector<128x1xi1> to vector<128x128xi1>
    %38 = vector.broadcast %cst_12 : f32 to vector<128x128xf32>
    %39 = arith.select %37, %38, %35 : vector<128x128xi1>, vector<128x128xf32>
    %40 = arith.truncf %32 : vector<128x128xf32> to vector<128x128xbf16>
    %c0_13 = arith.constant 0 : index
    %c0_14 = arith.constant 0 : index
    %c0_15 = arith.constant 0 : index
    %41 = vector.load %arg4[%c0_13, %c0_14, %c0_15] : memref<3x128x128xbf16, #tpu.memory_space<vmem>>, vector<1x128x128xbf16>
    %42 = vector.shape_cast %41 : vector<1x128x128xbf16> to vector<128x128xbf16>
    %cst_16 = arith.constant dense<0.000000e+00> : vector<128x128xf32>
    %43 = tpu.matmul %40, %42, %cst_16 {dimension_numbers = #tpu.dot_dimension_numbers<[1], [0], [0], [1], [0, 0, 1, 1], [], []>} : vector<128x128xbf16>, vector<128x128xbf16>, vector<128x128xf32> -> vector<128x128xf32>
    %44 = arith.truncf %8 : vector<128x128xf32> to vector<128x128xbf16>
    %c1 = arith.constant 1 : index
    %c0_17 = arith.constant 0 : index
    %c0_18 = arith.constant 0 : index
    %45 = vector.load %arg4[%c1, %c0_17, %c0_18] : memref<3x128x128xbf16, #tpu.memory_space<vmem>>, vector<1x128x128xbf16>
    %46 = vector.shape_cast %45 : vector<1x128x128xbf16> to vector<128x128xbf16>
    %cst_19 = arith.constant dense<0.000000e+00> : vector<128x128xf32>
    %47 = tpu.matmul %44, %46, %cst_19 {dimension_numbers = #tpu.dot_dimension_numbers<[1], [0], [0], [1], [0, 0, 1, 1], [], []>} : vector<128x128xbf16>, vector<128x128xbf16>, vector<128x128xf32> -> vector<128x128xf32>
    %48 = arith.addf %43, %47 : vector<128x128xf32>
    %49 = arith.truncf %39 : vector<128x128xf32> to vector<128x128xbf16>
    %c2 = arith.constant 2 : index
    %c0_20 = arith.constant 0 : index
    %c0_21 = arith.constant 0 : index
    %50 = vector.load %arg4[%c2, %c0_20, %c0_21] : memref<3x128x128xbf16, #tpu.memory_space<vmem>>, vector<1x128x128xbf16>
    %51 = vector.shape_cast %50 : vector<1x128x128xbf16> to vector<128x128xbf16>
    %cst_22 = arith.constant dense<0.000000e+00> : vector<128x128xf32>
    %52 = tpu.matmul %49, %51, %cst_22 {dimension_numbers = #tpu.dot_dimension_numbers<[1], [0], [0], [1], [0, 0, 1, 1], [], []>} : vector<128x128xbf16>, vector<128x128xbf16>, vector<128x128xf32> -> vector<128x128xf32>
    %53 = arith.addf %48, %52 : vector<128x128xf32>
    %c0_23 = arith.constant 0 : index
    %c0_24 = arith.constant 0 : index
    %54 = vector.load %arg5[%c0_23, %c0_24] : memref<1x128xf32, #tpu.memory_space<vmem>>, vector<1x128xf32>
    %55 = vector.broadcast %54 : vector<1x128xf32> to vector<128x128xf32>
    %56 = arith.addf %53, %55 : vector<128x128xf32>
    %cst_25 = arith.constant 0.000000e+00 : f32
    %57 = vector.broadcast %cst_25 : f32 to vector<128x128xf32>
    %58 = arith.maximumf %56, %57 : vector<128x128xf32>
    %59 = arith.truncf %58 : vector<128x128xf32> to vector<128x128xbf16>
    %c0_26 = arith.constant 0 : index
    %c0_27 = arith.constant 0 : index
    %60 = vector.load %arg6[%c0_26, %c0_27] : memref<128x128xbf16, #tpu.memory_space<vmem>>, vector<128x128xbf16>
    %cst_28 = arith.constant dense<0.000000e+00> : vector<128x128xf32>
    %61 = tpu.matmul %59, %60, %cst_28 {dimension_numbers = #tpu.dot_dimension_numbers<[1], [0], [0], [1], [0, 0, 1, 1], [], []>} : vector<128x128xbf16>, vector<128x128xbf16>, vector<128x128xf32> -> vector<128x128xf32>
    %c0_29 = arith.constant 0 : index
    %c0_30 = arith.constant 0 : index
    %62 = vector.load %arg7[%c0_29, %c0_30] : memref<1x128xf32, #tpu.memory_space<vmem>>, vector<1x128xf32>
    %63 = vector.broadcast %62 : vector<1x128xf32> to vector<128x128xf32>
    %64 = arith.addf %61, %63 : vector<128x128xf32>
    %65 = arith.addf %64, %0 : vector<128x128xf32>
    %cst_31 = arith.constant 0.000000e+00 : f32
    %66 = vector.broadcast %cst_31 : f32 to vector<128x128xf32>
    %67 = arith.maximumf %65, %66 : vector<128x128xf32>
    %c0_32 = arith.constant 0 : index
    %c0_33 = arith.constant 0 : index
    %68 = vector.load %arg8[%c0_32, %c0_33] : memref<128x128xf32, #tpu.memory_space<vmem>>, vector<128x128xf32>
    tpu.vector_store %arg8[%c0_32, %c0_33], %67 {strides = array<i32>} : memref<128x128xf32, #tpu.memory_space<vmem>>, vector<128x128xf32>,
    return
  }
  func.func @transform_0(%arg0: i32) -> (i32, i32) {
    %c0_i32 = arith.constant 0 : i32
    %c0_i32_0 = arith.constant 0 : i32
    return %arg0, %c0_i32 : i32, i32
  }
  func.func @transform_1(%arg0: i32) -> (i32, i32) {
    %c0_i32 = arith.constant 0 : i32
    %c0_i32_0 = arith.constant 0 : i32
    %c0_i32_1 = arith.constant 0 : i32
    return %c0_i32, %c0_i32_0 : i32, i32
  }
  func.func @transform_2(%arg0: i32) -> (i32, i32) {
    %c0_i32 = arith.constant 0 : i32
    %c0_i32_0 = arith.constant 0 : i32
    %c0_i32_1 = arith.constant 0 : i32
    return %c0_i32, %c0_i32_0 : i32, i32
  }
  func.func @transform_3(%arg0: i32) -> (i32, i32, i32) {
    %c0_i32 = arith.constant 0 : i32
    %c0_i32_0 = arith.constant 0 : i32
    %c0_i32_1 = arith.constant 0 : i32
    %c0_i32_2 = arith.constant 0 : i32
    return %c0_i32, %c0_i32_0, %c0_i32_1 : i32, i32, i32
  }
  func.func @transform_4(%arg0: i32) -> (i32, i32) {
    %c0_i32 = arith.constant 0 : i32
    %c0_i32_0 = arith.constant 0 : i32
    %c0_i32_1 = arith.constant 0 : i32
    return %c0_i32, %c0_i32_0 : i32, i32
  }
  func.func @transform_5(%arg0: i32) -> (i32, i32) {
    %c0_i32 = arith.constant 0 : i32
    %c0_i32_0 = arith.constant 0 : i32
    %c0_i32_1 = arith.constant 0 : i32
    return %c0_i32, %c0_i32_0 : i32, i32
  }
  func.func @transform_6(%arg0: i32) -> (i32, i32) {
    %c0_i32 = arith.constant 0 : i32
    %c0_i32_0 = arith.constant 0 : i32
    %c0_i32_1 = arith.constant 0 : i32
    return %c0_i32, %c0_i32_0 : i32, i32
  }
  func.func @transform_7(%arg0: i32) -> (i32, i32) {
    %c0_i32 = arith.constant 0 : i32
    %c0_i32_0 = arith.constant 0 : i32
    return %arg0, %c0_i32 : i32, i32
  }
}

</mosaic_0001>

<bundles_post_ra>
// kernel: _lambda_.1
= control target key start
LH: loop header
LB: loop body
LE: loop exit
PB: predicated region body
PF: predicated region fallthrough
CT: control target
= control target key end

     0   :  { %s2306_s24 = smov 0   ;;  %s2975_s0 = inlined_call_operand.vmem [shape: f32[256,128], index: 0, kind: input, shape index: {}]   ;;  %s2976_s1 = inlined_call_operand.vmem [shape: bf16[128,128], index: 1, kind: input, shape index: {}]   ;;  %s2977_s2 = inlined_call_operand.vmem [shape: f32[1,128], index: 2, kind: input, shape index: {}]   ;;  %s2978_s3 = inlined_call_operand.vmem [shape: bf16[3,128,128], index: 3, kind: input, shape index: {}]   ;;  %s2979_s4 = inlined_call_operand.vmem [shape: f32[1,128], index: 4, kind: input, shape index: {}]   ;;  %s2980_s5 = inlined_call_operand.vmem [shape: bf16[128,128], index: 5, kind: input, shape index: {}]   ;;  %s2981_s6 = inlined_call_operand.vmem [shape: f32[1,128], index: 6, kind: input, shape index: {}]   ;;  %s2982_s7 = inlined_call_operand.vmem [shape: f32[256,128], index: 7, kind: output, shape index: {}]  }
   0x1 LB: > { %s1738_s25 = sadd.s32 4294967295, %s2264_s24   ;;  %p1742_p0 = scmp.ge.s32.totalorder %s2264_s24, 1  ;;  %s2264_s24 = sphi %s2306_s24, %s17_s24  }
   0x2   : > { %p238_p1 = scmp.lt.s32.totalorder %s2264_s24, 3 }
   0x4   : > { %p239_p2 = pnand %p1742_p0, %p238_p1 }
   0x6   : > { %242 = sbr.rel (%p239_p2) target bundleno = 800 (0x320), region = 48 }
   0xd   : > { %v2216_v0 = vld [vmem:[%s2976_s1] sm:$0xff]   ;;  %s1743_s28 = sshll.u32 %s1738_s25, 4  ;;  %v2217_v1 = vld [vmem:[%s2976_s1 + $0x8] sm:$0xff]   ;;  %v2218_v2 = vld [vmem:[%s2976_s1 + $0x10] sm:$0xff]   ;;  %v491_v47 = vlaneseq }
   0xe   : > { %p271_p3 = scmp.lt.s32.totalorder %s1743_s28, 31  ;;  %2016 = vmatprep.subr.bf16.mxu0 %v2216_v0  ;;  %v2219_v3 = vld [vmem:[%s2976_s1 + $0x18] sm:$0xff]   ;;  %v2220_v7 = vld [vmem:[%s2976_s1 + $0x20] sm:$0xff]   ;;  %v2225_v9 = vld [vmem:[%s2978_s3 + $0x48] sm:$0xff]  }
   0xf   : > { %2017 = vmatpush3.bf16.msra.mxu0 %v2216_v0  ;;  %v2224_v8 = vld [vmem:[%s2978_s3 + $0x40] sm:$0xff]   ;;  %v2221_v10 = vld [vmem:[%s2976_s1 + $0x28] sm:$0xff]   ;;  %v2226_v11 = vld [vmem:[%s2978_s3 + $0x50] sm:$0xff]   ;;  %v2459_v50 = vshrl.u32 %v491_v47, 7 }
  0x10   : > { %s3042_s28 = smov (!%p271_p3, %s1743_s28), 31  ;;  %2018 = vmatprep.subr.bf16.mxu0 %v2217_v1  ;;  %2048 = vmatprep.subr.bf16.mxu1 %v2224_v8  ;;  %v2222_v12 = vld [vmem:[%s2976_s1 + $0x30] sm:$0xff]   ;;  %v2227_v13 = vld [vmem:[%s2978_s3 + $0x58] sm:$0xff]   ;;  %v2228_v15 = vld [vmem:[%s2978_s3 + $0x60] sm:$0xff]  }
  0x11   : > { %s1744_s10 = sshll.u32 %s3042_s28, 3  ;;  %2049 = vmatpush3.bf16.msra.mxu1 %v2224_v8  ;;  %v2223_v14 = vld [vmem:[%s2976_s1 + $0x38] sm:$0xff]   ;;  %v2229_v20 = vld [vmem:[%s2978_s3 + $0x68] sm:$0xff]   ;;  %v2230_v38 = vld [vmem:[%s2978_s3 + $0x70] sm:$0xff]   ;;  %v2464_v55 = vadd.s32 8, %v2459_v50  ;;  %vm732_vm0 = vcmp.lt.s32.totalorder %v2459_v50, 1 }
  0x12   : > { %s2331_s13 = scalar_lea.vmem %s2975_s0, %s1744_s10  ;;  %2050 = vmatprep.subr.bf16.mxu1 %v2225_v9  ;;  %v2231_v39 = vld [vmem:[%s2978_s3 + $0x78] sm:$0xff]   ;;  %v2433_v40 = vld [vmem:[%s2978_s3] sm:$0xff]   ;;  %v2249_v42 = vld [vmem:[%s2980_s5 + $0x8] sm:$0xff]   ;;  %vm829_vm1 = vcmp.lt.s32.totalorder %v2459_v50, 7  ;;  %v2984_v0 = vand.u32 7, %v2459_v50  ;;  %s2926_s20 = scalar_lea.vmem %s2982_s7, %s1744_s10 }
  0x13   : > { %2019 = vmatpush3.bf16.msra.mxu0 %v2217_v1  ;;  %v283_v4 = vld [vmem:[%s2331_s13] sm:$0xff]  ;;  %v284_v5 = vld [vmem:[%s2331_s13 + $0x8] sm:$0xff]  ;;  %v2366_v16 = vld [vmem:[%s2331_s13 + $0x10] sm:$0xff]  ;;  %v2983_v1 = vand.u32 7, %v2464_v55 }
  0x14   : > { %2020 = vmatprep.subr.bf16.mxu0 %v2218_v2  ;;  %v299_v6 = vpack.c.bf16 %v284_v5, %v283_v4  ;;  %v2369_v17 = vld [vmem:[%s2331_s13 + $0x18] sm:$0xff]  ;;  %v2372_v18 = vld [vmem:[%s2331_s13 + $0x20] sm:$0xff]  ;;  %v2375_v19 = vld [vmem:[%s2331_s13 + $0x28] sm:$0xff]  ;;  %vm2604_vm3 = vcmp.ne.s32.totalorder %v2984_v0, 0 }
  0x15   : > { %2051 = vmatpush3.bf16.msra.mxu1 %v2225_v9  ;;  %v300_v21 = vpack.c.bf16 %v2369_v17, %v2366_v16  ;;  %v301_v22 = vpack.c.bf16 %v2375_v19, %v2372_v18  ;;  %v2385_v23 = vld [vmem:[%s2331_s13 + $0x30] sm:$0xff]  ;;  %v2388_v24 = vld [vmem:[%s2331_s13 + $0x38] sm:$0xff]  ;;  %v2391_v25 = vld [vmem:[%s2331_s13 + $0x40] sm:$0xff]  ;;  %vm2598_vm2 = vcmp.ne.s32.totalorder %v2983_v1, 0 }
  0x16   : > { %2032 = vmatprep.mubr.bf16.mxu0 %v299_v6  ;;  %2052 = vmatprep.subr.bf16.mxu1 %v2226_v11  ;;  %v2394_v26 = vld [vmem:[%s2331_s13 + $0x48] sm:$0xff]  ;;  %v302_v27 = vpack.c.bf16 %v2388_v24, %v2385_v23  ;;  %v2401_v29 = vld [vmem:[%s2331_s13 + $0x50] sm:$0xff]  ;;  %v2404_v30 = vld [vmem:[%s2331_s13 + $0x58] sm:$0xff] }
  0x17   : > { %2021 = vmatpush3.bf16.msra.mxu0 %v2218_v2  ;;  %v303_v28 = vpack.c.bf16 %v2394_v26, %v2391_v25  ;;  %v2407_v31 = vld [vmem:[%s2331_s13 + $0x60] sm:$0xff]  ;;  %v2410_v32 = vld [vmem:[%s2331_s13 + $0x68] sm:$0xff]  ;;  %v304_v33 = vpack.c.bf16 %v2404_v30, %v2401_v29  ;;  %v2417_v35 = vld [vmem:[%s2331_s13 + $0x70] sm:$0xff] }
  0x18   : > { %2022 = vmatprep.subr.bf16.mxu0 %v2219_v3  ;;  %2992 = vst [vmem:[#allocation2_spill] sm:$0xff] %v2407_v31  ;;  %2993 = vst [vmem:[#allocation3_spill] sm:$0xff] %v2410_v32  ;;  %v305_v34 = vpack.c.bf16 %v2410_v32, %v2407_v31  ;;  %v2420_v36 = vld [vmem:[%s2331_s13 + $0x78] sm:$0xff]  ;;  %v2248_v41 = vld [vmem:[%s2980_s5] sm:$0xff]  }
  0x19   : > { %2053 = vmatpush3.bf16.msra.mxu1 %v2226_v11  ;;  %2994 = vst [vmem:[#allocation4_spill] sm:$0xff] %v2420_v36  ;;  %v306_v37 = vpack.c.bf16 %v2420_v36, %v2417_v35  ;;  %v2250_v43 = vld [vmem:[%s2980_s5 + $0x10] sm:$0xff]   ;;  %v2251_v44 = vld [vmem:[%s2980_s5 + $0x18] sm:$0xff]   ;;  %v2252_v45 = vld [vmem:[%s2980_s5 + $0x20] sm:$0xff]  }
  0x1a   : > { %2054 = vmatprep.subr.bf16.mxu1 %v2227_v13  ;;  %v2253_v46 = vld [vmem:[%s2980_s5 + $0x28] sm:$0xff]   ;;  %v2457_v48 = vld [vmem:[%s2977_s2] ss:$0 sm:$0xff]  ;;  %v2234_v47 = vld [vmem:[%s2978_s3 + $0x10] sm:$0xff]  }
  0x1b   : > { %2023 = vmatpush3.bf16.msra.mxu0 %v2219_v3  ;;  %vm1790_vm4 = vmpackc.low %vm2598_vm2, %vm2604_vm3 }
  0x1c   : > { %2024 = vmatprep.subr.bf16.mxu0 %v2220_v7 }
  0x1d   : > { %2055 = vmatpush3.bf16.msra.mxu1 %v2227_v13 }
  0x1e   : > { %2056 = vmatprep.subr.bf16.mxu1 %v2228_v15 }
  0x1f   : > { %2025 = vmatpush3.bf16.msra.mxu0 %v2220_v7 }
  0x20   : > { %2026 = vmatprep.subr.bf16.mxu0 %v2221_v10 }
  0x21   : > { %2057 = vmatpush3.bf16.msra.mxu1 %v2228_v15 }
  0x22   : > { %2058 = vmatprep.subr.bf16.mxu1 %v2229_v20 }
  0x23   : > { %2027 = vmatpush3.bf16.msra.mxu0 %v2221_v10 }
  0x24   : > { %2028 = vmatprep.subr.bf16.mxu0 %v2222_v12 }
  0x25   : > { %2059 = vmatpush3.bf16.msra.mxu1 %v2229_v20  ;;  %v2233_v20 = vld [vmem:[%s2978_s3 + $0x8] sm:$0xff]  }
  0x26   : > { %2060 = vmatprep.subr.bf16.mxu1 %v2230_v38 }
  0x27   : > { %2029 = vmatpush3.bf16.msra.mxu0 %v2222_v12 }
  0x28   : > { %2030 = vmatprep.subr.bf16.mxu0 %v2223_v14 }
  0x29   : > { %2061 = vmatpush3.bf16.msra.mxu1 %v2230_v38 }
  0x2a   : > { %2062 = vmatprep.subr.bf16.mxu1 %v2231_v39 }
  0x2b   : > { %2031 = vmatpush3.bf16.msra.mxu0 %v2223_v14 }
  0x2c   : > { %2144 = vmatprep.subr.bf16.mxu0 %v2248_v41 }
  0x2d   : > { %2063 = vmatpush3.bf16.msra.mxu1 %v2231_v39 }
  0x2e   : > { %2033 = vmatmul.mubr.bf16.vlgmr.msra.gmra.mrb[0].mxu0 %v300_v21  ;;  %2080 = vmatprep.subr.bf16.mxu1 %v2433_v40 }
  0x2f   : > { %2036 = vmatprep.mubr.bf16.mxu0 %v301_v22  ;;  %2145 = vmatpush3.bf16.msra.mxu0 %v2248_v41 }
  0x30   : > { %2146 = vmatprep.subr.bf16.mxu0 %v2249_v42 }
  0x33   : > { %2147 = vmatpush3.bf16.msra.mxu0 %v2249_v42 }
  0x34   : > { %2148 = vmatprep.subr.bf16.mxu0 %v2250_v43 }
  0x36   : > { %2037 = vmatmul.mubr.bf16.gmra.mrb[4].mxu0 %v302_v27 }
  0x37   : > { %2040 = vmatprep.mubr.bf16.mxu0 %v303_v28  ;;  %2149 = vmatpush3.bf16.msra.mxu0 %v2250_v43 }
  0x38   : > { %2150 = vmatprep.subr.bf16.mxu0 %v2251_v44 }
  0x3b   : > { %2151 = vmatpush3.bf16.msra.mxu0 %v2251_v44  ;;  %v2521_v44 = vadd.s32 16, %v2459_v50 }
  0x3c   : > { %2152 = vmatprep.subr.bf16.mxu0 %v2252_v45 }
  0x3e   : > { %2041 = vmatmul.mubr.bf16.gmra.mrb[8].mxu0 %v304_v33 }
  0x3f   : > { %2044 = vmatprep.mubr.bf16.mxu0 %v305_v34  ;;  %2153 = vmatpush3.bf16.msra.mxu0 %v2252_v45 }
  0x40   : > { %2154 = vmatprep.subr.bf16.mxu0 %v2253_v46 }
  0x43   : > { %2155 = vmatpush3.bf16.msra.mxu0 %v2253_v46 }
  0x46   : > { %2045 = vmatmul.mubr.bf16.gmra.mrb[12].mxu0 %v306_v37 }
 0x101   : > { %v2034_v49 = vpop.f32.mrb[0].mxu0 }
 0x102   : > { %v421_v51 = vadd.f32 %v2034_v49, %v2457_v48  ;;  %v412_v52 = vpop.f32.mrb[1].mxu0  ;;  %v2531_v49 = vadd.s32 24, %v2459_v50 }
 0x103   : > { %v413_v53 = vadd.f32 %v2457_v48, %v412_v52  ;;  %v2035_v54 = vpop.f32.mrb[2].mxu0 }
 0x104   : > { %v477_v56 = vmax.f32 %v421_v51, 0.0  ;;  %v424_v57 = vadd.f32 %v2035_v54, %v2457_v48  ;;  %v415_v58 = vpop.f32.mrb[3].mxu0  ;;  %v2534_v51 = vadd.s32 32, %v2459_v50 }
 0x105   : > { %v2467_v59 = vmax.f32 %v413_v53, 0.0  ;;  %v416_v60 = vadd.f32 %v2457_v48, %v415_v58 }
 0x106   : > { %v2470_v61 = vmax.f32 %v424_v57, 0.0  ;;  %v718_v62 = vrot.slane %v477_v56, 7  ;;  %v815_v2 = vrot.slane %v477_v56, 1 }
 0x107   : > { %v476_v63 = vmax.f32 %v416_v60, 0.0  ;;  %v2986_v6 = vrot.slane %v2467_v59, 7  ;;  %v2985_v11 = vrot.slane %v2467_v59, 1 }
 0x108   : > { %v719_v3 = vrot.slane %v2470_v61, 7  ;;  %v816_v4 = vrot.slane %v2470_v61, 1  ;;  %v919_v5 = vpack.c.bf16 %v2470_v61, %v477_v56 }
 0x109   : > { %v717_v7 = vrot.slane %v476_v63, 7  ;;  %v814_v8 = vrot.slane %v476_v63, 1  ;;  %v2038_v9 = vpop.f32.mrb[4].mxu0  ;;  %v918_v10 = vpack.c.bf16 %v476_v63, %v2467_v59 }
 0x10a   : > { %v2484_v12 = vsel %vm732_vm0, %v718_v62, %v719_v3  ;;  %v2488_v13 = vsel %vm829_vm1, %v815_v2, %v816_v4  ;;  %v437_v14 = vadd.f32 %v2038_v9, %v2457_v48  ;;  %v428_v15 = vpop.f32.mrb[5].mxu0 }
 0x10b   : > { %v2496_v21 = vsel %vm732_vm0, %v717_v7, %v718_v62  ;;  %v429_v22 = vadd.f32 %v2457_v48, %v428_v15  ;;  %v2039_v27 = vpop.f32.mrb[6].mxu0  ;;  %2064 = vmatprep.mubr.bf16.mxu1 %v918_v10  ;;  %v2503_v28 = vsel %vm732_vm0, %v2986_v6, %v717_v7  ;;  %v2507_v33 = vsel %vm829_vm1, %v814_v8, %v815_v2 }
 0x10c   : > { %v481_v37 = vmax.f32 %v437_v14, 0.0  ;;  %v440_v38 = vadd.f32 %v2039_v27, %v2457_v48  ;;  %v431_v39 = vpop.f32.mrb[7].mxu0  ;;  %2065 = vmatmul.mubr.bf16.vlgmr.msra.gmra.mrb[0].mxu1 %v919_v5  ;;  %v2516_v41 = vsel %vm829_vm1, %v2985_v11, %v814_v8  ;;  %v2235_v14 = vld [vmem:[%s2978_s3 + $0x18] sm:$0xff]  }
 0x10d   : > { %v479_v42 = vmax.f32 %v429_v22, 0.0  ;;  %v432_v43 = vadd.f32 %v2457_v48, %v431_v39  ;;  %2081 = vmatpush3.bf16.msra.mxu1 %v2433_v40  ;;  %v2537_v40 = vadd.s32 40, %v2459_v50 }
 0x10e   : > { %v2525_v46 = vmax.f32 %v440_v38, 0.0  ;;  %2082 = vmatprep.subr.bf16.mxu1 %v2233_v20  ;;  %v722_v52 = vrot.slane %v481_v37, 7  ;;  %v819_v57 = vrot.slane %v481_v37, 1 }
 0x10f   : > { %v720_v53 = vrot.slane %v479_v42, 7  ;;  %v817_v54 = vrot.slane %v479_v42, 1  ;;  %v480_v56 = vmax.f32 %v432_v43, 0.0 }
 0x110   : > { %v723_v58 = vrot.slane %v2525_v46, 7  ;;  %v820_v60 = vrot.slane %v2525_v46, 1  ;;  %v921_v61 = vpack.c.bf16 %v2525_v46, %v481_v37 }
 0x111   : > { %v2544_v62 = vsel %vm829_vm1, %v816_v4, %v817_v54  ;;  %v721_v63 = vrot.slane %v480_v56, 7  ;;  %v818_v2 = vrot.slane %v480_v56, 1  ;;  %2083 = vmatpush3.bf16.msra.mxu1 %v2233_v20  ;;  %v2042_v5 = vpop.f32.mrb[8].mxu0  ;;  %v920_v7 = vpack.c.bf16 %v480_v56, %v479_v42 }
 0x112   : > { %v453_v9 = vadd.f32 %v2042_v5, %v2457_v48  ;;  %v444_v10 = vpop.f32.mrb[9].mxu0  ;;  %2084 = vmatprep.subr.bf16.mxu1 %v2234_v47  ;;  %v2554_v4 = vsel %vm732_vm0, %v719_v3, %v720_v53  ;;  %v2558_v15 = vsel %vm732_vm0, %v722_v52, %v723_v58 }
 0x113   : > { %v445_v20 = vadd.f32 %v2457_v48, %v444_v10  ;;  %v2043_v22 = vpop.f32.mrb[10].mxu0  ;;  %2068 = vmatprep.mubr.bf16.mxu1 %v920_v7  ;;  %v2563_v27 = vsel %vm732_vm0, %v720_v53, %v721_v63  ;;  %v2567_v37 = vsel %vm732_vm0, %v721_v63, %v722_v52  ;;  %v2571_v3 = vsel %vm829_vm1, %v818_v2, %v819_v57  ;;  %v2237_v7 = vld [vmem:[%s2978_s3 + $0x28] sm:$0xff]  }
 0x114   : > { %v485_v38 = vmax.f32 %v453_v9, 0.0  ;;  %v456_v39 = vadd.f32 %v2043_v22, %v2457_v48  ;;  %v447_v42 = vpop.f32.mrb[11].mxu0  ;;  %2069 = vmatmul.mubr.bf16.gmra.mrb[4].mxu1 %v921_v61  ;;  %v2581_v52 = vsel %vm829_vm1, %v817_v54, %v818_v2  ;;  %v2585_v63 = vsel %vm829_vm1, %v819_v57, %v820_v60  ;;  %v2236_v61 = vld [vmem:[%s2978_s3 + $0x20] sm:$0xff]  }
 0x115   : > { %v483_v53 = vmax.f32 %v445_v20, 0.0  ;;  %v448_v56 = vadd.f32 %v2457_v48, %v447_v42  ;;  %2085 = vmatpush3.bf16.msra.mxu1 %v2234_v47  ;;  %v2240_v57 = vld [vmem:[%s2978_s3 + $0x80] sm:$0xff]   ;;  %v3004_v22 = vand.u32 7, %v2521_v44 }
 0x116   : > { %v2587_v5 = vmax.f32 %v456_v39, 0.0  ;;  %2086 = vmatprep.subr.bf16.mxu1 %v2235_v14  ;;  %v726_v54 = vrot.slane %v485_v38, 7  ;;  %v823_v39 = vrot.slane %v485_v38, 1 }
 0x117   : > { %v724_v2 = vrot.slane %v483_v53, 7  ;;  %v821_v10 = vrot.slane %v483_v53, 1  ;;  %v484_v20 = vmax.f32 %v448_v56, 0.0  ;;  %vm2737_vm6 = vcmp.ne.s32.totalorder %v3004_v22, 0  ;;  %v2241_v22 = vld [vmem:[%s2978_s3 + $0x88] sm:$0xff]  }
 0x118   : > { %v727_v42 = vrot.slane %v2587_v5, 7  ;;  %v824_v47 = vrot.slane %v2587_v5, 1  ;;  %v923_v8 = vpack.c.bf16 %v2587_v5, %v485_v38 }
 0x119   : > { %v725_v56 = vrot.slane %v484_v20, 7  ;;  %v822_v45 = vrot.slane %v484_v20, 1  ;;  %2087 = vmatpush3.bf16.msra.mxu1 %v2235_v14  ;;  %v2046_v1 = vpop.f32.mrb[12].mxu0  ;;  %v922_v46 = vpack.c.bf16 %v484_v20, %v483_v53  ;;  %v2613_v43 = vsel %vm732_vm0, %v723_v58, %v724_v2 }
 0x11a   : > { %v469_v0 = vadd.f32 %v2046_v1, %v2457_v48  ;;  %v460_v34 = vpop.f32.mrb[13].mxu0  ;;  %2088 = vmatprep.subr.bf16.mxu1 %v2236_v61  ;;  %v2621_v38 = vsel %vm732_vm0, %v726_v54, %v727_v42  ;;  %v2625_v14 = vsel %vm829_vm1, %v820_v60, %v821_v10  ;;  %v2629_v58 = vsel %vm829_vm1, %v823_v39, %v824_v47 }
 0x11b   : > { %v461_v1 = vadd.f32 %v2457_v48, %v460_v34  ;;  %v2047_v53 = vpop.f32.mrb[14].mxu0  ;;  %2072 = vmatprep.mubr.bf16.mxu1 %v922_v46  ;;  %v2634_v5 = vsel %vm732_vm0, %v724_v2, %v725_v56  ;;  %v2638_v20 = vsel %vm732_vm0, %v725_v56, %v726_v54  ;;  %v2650_v54 = vsel %vm829_vm1, %v822_v45, %v823_v39 }
 0x11c   : > { %v489_v11 = vmax.f32 %v469_v0, 0.0  ;;  %v472_v9 = vadd.f32 %v2047_v53, %v2457_v48  ;;  %v463_v6 = vpop.f32.mrb[15].mxu0  ;;  %2073 = vmatmul.mubr.bf16.gmra.mrb[8].mxu1 %v923_v8  ;;  %v2654_v0 = vsel %vm829_vm1, %v821_v10, %v822_v45  ;;  %v2238_v8 = vld [vmem:[%s2978_s3 + $0x30] sm:$0xff]  }
 0x11d   : > { %v487_v2 = vmax.f32 %v461_v1, 0.0  ;;  %v464_v32 = vadd.f32 %v2457_v48, %v463_v6  ;;  %2089 = vmatpush3.bf16.msra.mxu1 %v2236_v61  ;;  %v2999_v1 = vrot.slane %v2467_v59, 7 }
 0x11e   : > { %v490_v56 = vmax.f32 %v472_v9, 0.0  ;;  %2090 = vmatprep.subr.bf16.mxu1 %v2237_v7  ;;  %v730_v6 = vrot.slane %v489_v11, 7  ;;  %v827_v46 = vrot.slane %v489_v11, 1 }
 0x11f   : > { %v728_v61 = vrot.slane %v487_v2, 7  ;;  %v825_v39 = vrot.slane %v487_v2, 1  ;;  %v488_v60 = vmax.f32 %v464_v32, 0.0  ;;  %v2239_v32 = vld [vmem:[%s2978_s3 + $0x38] sm:$0xff]  }
 0x120   : > { %v731_v45 = vrot.slane %v490_v56, 7  ;;  %v828_v10 = vrot.slane %v490_v56, 1  ;;  %v925_v9 = vpack.c.bf16 %v490_v56, %v489_v11 }
 0x121   : > { %v729_v34 = vrot.slane %v488_v60, 7  ;;  %v826_v36 = vrot.slane %v488_v60, 1  ;;  %2091 = vmatpush3.bf16.msra.mxu1 %v2237_v7  ;;  %v924_v31 = vpack.c.bf16 %v488_v60, %v487_v2  ;;  %v2665_v53 = vsel %vm732_vm0, %v727_v42, %v728_v61 }
 0x122   : > { %2092 = vmatprep.subr.bf16.mxu1 %v2238_v8  ;;  %v748_v48 = vsel %vm732_vm0, %v731_v45, %v2999_v1  ;;  %v2680_v11 = vsel %vm732_vm0, %v730_v6, %v731_v45  ;;  %v2684_v7 = vsel %vm829_vm1, %v824_v47, %v825_v39  ;;  %v2688_v42 = vsel %vm829_vm1, %v827_v46, %v828_v10 }
 0x123   : > { %2076 = vmatprep.mubr.bf16.mxu1 %v924_v31  ;;  %v1791_v60 = vpack.c.bf16 %v2503_v28, %v748_v48  ;;  %v2693_v2 = vsel %vm732_vm0, %v728_v61, %v729_v34  ;;  %v2697_v56 = vsel %vm732_vm0, %v729_v34, %v730_v6  ;;  %v2707_v28 = vsel %vm829_vm1, %v826_v36, %v827_v46 }
 0x124   : > { %2077 = vmatmul.mubr.bf16.gmra.mrb[12].mxu1 %v925_v9  ;;  %v1821_v47 = vpack.c.bf16 %v2693_v2, %v2665_v53  ;;  %v1826_v31 = vpack.c.bf16 %v2680_v11, %v2697_v56  ;;  %v2711_v48 = vsel %vm829_vm1, %v825_v39, %v826_v36  ;;  %v3000_v34 = vand.u32 7, %v2531_v49  ;;  %v2242_v9 = vld [vmem:[%s2978_s3 + $0x90] sm:$0xff]  }
 0x125   : > { %2093 = vmatpush3.bf16.msra.mxu1 %v2238_v8  ;;  %2096 = vmatprep.mubr.msk.bf16.mxu1 %vm1790_vm4, %v1791_v60  ;;  %v3003_v61 = vrot.slane %v2467_v59, 1  ;;  %v2742_v39 = vadd.s32 48, %v2459_v50  ;;  %v2745_v59 = vadd.s32 56, %v2459_v50  ;;  %v3010_v60 = vand.u32 7, %v2534_v51 }
 0x126   : > { %vm2720_vm5 = vcmp.ne.s32.totalorder %v3000_v34, 0  ;;  %2094 = vmatprep.subr.bf16.mxu1 %v2239_v32  ;;  %v2758_v34 = vadd.s32 64, %v2459_v50  ;;  %v3011_v6 = vpack.c.bf16 %v2484_v12, %v2496_v21  ;;  %v3012_v8 = vpack.c.bf16 %v2563_v27, %v2554_v4 }
 0x127   : > { %v2730_v36 = vsel %vm829_vm1, %v828_v10, %v3003_v61  ;;  %v3007_v10 = vand.u32 7, %v2537_v40  ;;  %vm1909_vm8 = vcmp.ne.s32.totalorder %v3010_v60, 0  ;;  %v2761_v61 = vadd.s32 72, %v2459_v50  ;;  %vm1795_vm9 = vmpackc.low %vm2720_vm5, %vm2737_vm6 }
 0x128   : > { %v561_v60 = vand.u32 7, %v2745_v59  ;;  %v2990_v45 = vand.u32 7, %v2758_v34  ;;  %v2798_v21 = vadd.s32 80, %v2459_v50  ;;  %v2801_v4 = vadd.s32 88, %v2459_v50 }
 0x129   : > { %vm2751_vm7 = vcmp.ne.s32.totalorder %v3007_v10, 0  ;;  %2095 = vmatpush3.bf16.msra.mxu1 %v2239_v32  ;;  %v554_v10 = vand.u32 7, %v2742_v39  ;;  %v2991_v32 = vand.u32 7, %v2761_v61  ;;  %v3019_v46 = vpack.c.bf16 %v2558_v15, %v2567_v37  ;;  %v2245_v15 = vld [vmem:[%s2978_s3 + $0xa8] sm:$0xff]  }
 0x12a   : > { %2112 = vmatprep.subr.bf16.mxu1 %v2240_v57  ;;  %vm1800_vm10 = vmpackc.low %vm2751_vm7, %vm1909_vm8  ;;  %vm2787_vm11 = vcmp.ne.s32.totalorder %v561_v60, 0  ;;  %vm1913_vm14 = vcmp.ne.s32.totalorder %v2990_v45, 0  ;;  %v582_v1 = vand.u32 7, %v2798_v21  ;;  %v589_v45 = vand.u32 7, %v2801_v4  ;;  %v2244_v21 = vld [vmem:[%s2978_s3 + $0xa0] sm:$0xff]  }
 0x12b   : > { %vm2793_vm12 = vcmp.ne.s32.totalorder %v554_v10, 0  ;;  %vm2805_vm13 = vcmp.ne.s32.totalorder %v2991_v32, 0  ;;  %v3020_v12 = vpack.c.bf16 %v2634_v5, %v2613_v43  ;;  %v506_v4 = vadd.s32 112, %v2459_v50 }
 0x12c   : > { %2097 = vmatmul.mubr.msk.bf16.vlgmr.msra.gmra.mrb[0].mxu1 %vm1795_vm9, %v3011_v6  ;;  %v2815_v6 = vadd.s32 104, %v2459_v50  ;;  %vm1805_vm15 = vmpackc.low %vm2787_vm11, %vm2793_vm12  ;;  %vm1914_vm1 = vcmp.ne.s32.totalorder %v589_v45, 0  ;;  %vm1915_vm2 = vcmp.ne.s32.totalorder %v582_v1, 0  ;;  %v507_v27 = vadd.s32 120, %v2459_v50 }
 0x12d   : > { %2113 = vmatpush3.bf16.msra.mxu1 %v2240_v57  ;;  %2100 = vmatprep.mubr.msk.bf16.mxu1 %vm1800_vm10, %v3012_v8  ;;  %v2812_v57 = vadd.s32 96, %v2459_v50  ;;  %vm1810_vm0 = vmpackc.low %vm2805_vm13, %vm1913_vm14  ;;  %v2243_v8 = vld [vmem:[%s2978_s3 + $0x98] sm:$0xff]   ;;  %v610_v37 = vand.u32 7, %v506_v4  ;;  %v3021_v5 = vpack.c.bf16 %v2621_v38, %v2638_v20  ;;  %v3026_v20 = vand.u32 7, %v2521_v44 }
 0x12e   : > { %2114 = vmatprep.subr.bf16.mxu1 %v2241_v22  ;;  %vm1815_vm5 = vmpackc.low %vm1914_vm1, %vm1915_vm2  ;;  %v617_v43 = vand.u32 7, %v507_v27  ;;  %v2247_v38 = vld [vmem:[%s2978_s3 + $0xb8] sm:$0xff]   ;;  %v3027_v53 = vand.u32 7, %v2537_v40  ;;  %v3028_v2 = vand.u32 7, %v2534_v51  ;;  %v3031_v44 = vand.u32 7, %v2761_v61 }
 0x12f   : > { %v596_v32 = vand.u32 7, %v2812_v57  ;;  %vm1919_vm8 = vcmp.ne.s32.totalorder %v610_v37, 0  ;;  %v3022_v57 = vand.u32 7, %v2464_v55  ;;  %v3024_v55 = vpack.c.bf16 %v2507_v33, %v2516_v41 }
 0x130   : > { %vm1918_vm7 = vcmp.ne.s32.totalorder %v617_v43, 0  ;;  %vm1923_vm14 = vcmp.ne.s32.totalorder %v3026_v20, 7  ;;  %v3029_v33 = vpack.c.bf16 %v2544_v62, %v2488_v13  ;;  %v3030_v41 = vpack.c.bf16 %v2571_v3, %v2581_v52  ;;  %v2254_v52 = vld [vmem:[%s2980_s5 + $0x30] sm:$0xff]  }
 0x131   : > { %2115 = vmatpush3.bf16.msra.mxu1 %v2241_v22  ;;  %v603_v22 = vand.u32 7, %v2815_v6  ;;  %vm1917_vm4 = vcmp.ne.s32.totalorder %v596_v32, 0  ;;  %vm1920_vm9 = vcmp.ne.s32.totalorder %v3022_v57, 7  ;;  %v3023_v6 = vand.u32 7, %v2459_v50  ;;  %vm1825_vm11 = vmpackc.low %vm1918_vm7, %vm1919_vm8  ;;  %2156 = vmatprep.subr.bf16.mxu0 %v2254_v52 }
 0x132   : > { %2116 = vmatprep.subr.bf16.mxu1 %v2242_v9  ;;  %v3025_v50 = vand.u32 7, %v2531_v49  ;;  %v3032_v49 = vand.u32 7, %v2758_v34  ;;  %v3033_v13 = vpack.c.bf16 %v2625_v14, %v2585_v63  ;;  %v3034_v51 = vpack.c.bf16 %v2650_v54, %v2654_v0  ;;  %2157 = vmatpush3.bf16.msra.mxu0 %v2254_v52  ;;  %v2255_v63 = vld [vmem:[%s2980_s5 + $0x38] sm:$0xff]   ;;  %v1892_v14 = vld [vmem:[%s2979_s4] ss:$0 sm:$0xff] }
 0x133   : > { %vm1916_vm3 = vcmp.ne.s32.totalorder %v603_v22, 0  ;;  %vm1921_vm10 = vcmp.ne.s32.totalorder %v3023_v6, 7  ;;  %v3035_v40 = vpack.c.bf16 %v2684_v7, %v2629_v58  ;;  %v3036_v62 = vpack.c.bf16 %v2707_v28, %v2711_v48  ;;  %2158 = vmatprep.subr.bf16.mxu0 %v2255_v63 }
 0x134   : > { %2101 = vmatmul.mubr.msk.bf16.gmra.mrb[4].mxu1 %vm1805_vm15, %v3019_v46  ;;  %vm1820_vm6 = vmpackc.low %vm1916_vm3, %vm1917_vm4  ;;  %vm1922_vm13 = vcmp.ne.s32.totalorder %v3025_v50, 7  ;;  %vm1924_vm15 = vcmp.ne.s32.totalorder %v3027_v53, 7  ;;  %vm1926_vm3 = vcmp.ne.s32.totalorder %v561_v60, 7  ;;  %vm1927_vm4 = vcmp.ne.s32.totalorder %v554_v10, 7 }
 0x135   : > { %2117 = vmatpush3.bf16.msra.mxu1 %v2242_v9  ;;  %2104 = vmatprep.mubr.msk.bf16.mxu1 %vm1810_vm0, %v3020_v12  ;;  %v2246_v9 = vld [vmem:[%s2978_s3 + $0xb0] sm:$0xff]   ;;  %vm1854_vm12 = vmpackc.low %vm1920_vm9, %vm1921_vm10  ;;  %vm1925_vm0 = vcmp.ne.s32.totalorder %v3028_v2, 7  ;;  %vm1930_vm9 = vcmp.ne.s32.totalorder %v589_v45, 7  ;;  %vm1931_vm10 = vcmp.ne.s32.totalorder %v582_v1, 7  ;;  %v3037_v3 = vpack.c.bf16 %v2730_v36, %v2688_v42 }
 0x136   : > { %2118 = vmatprep.subr.bf16.mxu1 %v2243_v8  ;;  %vm1859_vm1 = vmpackc.low %vm1922_vm13, %vm1923_vm14  ;;  %2159 = vmatpush3.bf16.msra.mxu0 %v2255_v63 }
 0x137   : > { %vm1864_vm2 = vmpackc.low %vm1924_vm15, %vm1925_vm0  ;;  %vm1934_vm15 = vcmp.ne.s32.totalorder %v617_v43, 7  ;;  %vm1935_vm0 = vcmp.ne.s32.totalorder %v610_v37, 7 }
 0x138   : > { %vm1869_vm7 = vmpackc.low %vm1926_vm3, %vm1927_vm4 }
 0x139   : > { %2119 = vmatpush3.bf16.msra.mxu1 %v2243_v8  ;;  %vm1879_vm13 = vmpackc.low %vm1930_vm9, %vm1931_vm10 }
 0x13a   : > { %2120 = vmatprep.subr.bf16.mxu1 %v2244_v21 }
 0x13c   : > { %2105 = vmatmul.mubr.msk.bf16.gmra.mrb[8].mxu1 %vm1815_vm5, %v3021_v5  ;;  %vm1928_vm5 = vcmp.ne.s32.totalorder %v3031_v44, 7 }
 0x13d   : > { %2121 = vmatpush3.bf16.msra.mxu1 %v2244_v21  ;;  %2108 = vmatprep.mubr.msk.bf16.mxu1 %vm1820_vm6, %v1821_v47  ;;  %vm1929_vm6 = vcmp.ne.s32.totalorder %v3032_v49, 7 }
 0x13e   : > { %2122 = vmatprep.subr.bf16.mxu1 %v2245_v15  ;;  %vm1874_vm8 = vmpackc.low %vm1928_vm5, %vm1929_vm6 }
 0x141   : > { %2123 = vmatpush3.bf16.msra.mxu1 %v2245_v15 }
 0x142   : > { %2124 = vmatprep.subr.bf16.mxu1 %v2246_v9 }
 0x144   : > { %2109 = vmatmul.mubr.msk.bf16.gmra.mrb[12].mxu1 %vm1825_vm11, %v1826_v31  ;;  %vm1932_vm11 = vcmp.ne.s32.totalorder %v603_v22, 7 }
 0x145   : > { %2125 = vmatpush3.bf16.msra.mxu1 %v2246_v9  ;;  %2128 = vmatprep.mubr.msk.bf16.mxu1 %vm1854_vm12, %v3024_v55  ;;  %vm1933_vm12 = vcmp.ne.s32.totalorder %v596_v32, 7 }
 0x146   : > { %2126 = vmatprep.subr.bf16.mxu1 %v2247_v38  ;;  %vm1884_vm14 = vmpackc.low %vm1932_vm11, %vm1933_vm12 }
 0x149   : > { %2127 = vmatpush3.bf16.msra.mxu1 %v2247_v38 }
 0x14c   : > { %2129 = vmatmul.mubr.msk.bf16.vlgmr.msra.gmra.mrb[0].mxu1 %vm1859_vm1, %v3029_v33  ;;  %vm1889_vm1 = vmpackc.low %vm1934_vm15, %vm1935_vm0 }
 0x14d   : > { %2132 = vmatprep.mubr.msk.bf16.mxu1 %vm1864_vm2, %v3030_v41 }
 0x154   : > { %2133 = vmatmul.mubr.msk.bf16.gmra.mrb[4].mxu1 %vm1869_vm7, %v3033_v13 }
 0x155   : > { %2136 = vmatprep.mubr.msk.bf16.mxu1 %vm1874_vm8, %v3034_v51 }
 0x15c   : > { %2137 = vmatmul.mubr.msk.bf16.gmra.mrb[8].mxu1 %vm1879_vm13, %v3035_v40 }
 0x15d   : > { %2140 = vmatprep.mubr.msk.bf16.mxu1 %vm1884_vm14, %v3036_v62 }
 0x164   : > { %2141 = vmatmul.mubr.msk.bf16.gmra.mrb[12].mxu1 %vm1889_vm1, %v3037_v3 }
 0x21f   : > { %v2130_v58 = vpop.f32.mrb[0].mxu1 }
 0x220   : > { %v1428_v54 = vadd.f32 %v2130_v58, %v1892_v14  ;;  %v1340_v0 = vpop.f32.mrb[1].mxu1 }
 0x221   : > { %v1426_v11 = vadd.f32 %v1892_v14, %v1340_v0  ;;  %v2131_v7 = vpop.f32.mrb[2].mxu1 }
 0x222   : > { %v1429_v42 = vadd.f32 %v2131_v7, %v1892_v14  ;;  %v1343_v56 = vpop.f32.mrb[3].mxu1  ;;  %v1444_v47 = vmax.f32 %v1428_v54, 0.0  ;;  %v2915_v7 = vld [vmem:[%s2981_s6] ss:$0 sm:$0xff] }
 0x223   : > { %v1427_v1 = vadd.f32 %v1892_v14, %v1343_v56  ;;  %v1442_v28 = vmax.f32 %v1426_v11, 0.0 }
 0x224   : > { %v1445_v31 = vmax.f32 %v1429_v42, 0.0 }
 0x225   : > { %v1443_v48 = vmax.f32 %v1427_v1, 0.0 }
 0x226   : > { %v1459_v36 = vpack.c.bf16 %v1445_v31, %v1444_v47 }
 0x227   : > { %v1458_v39 = vpack.c.bf16 %v1443_v48, %v1442_v28  ;;  %v2134_v59 = vpop.f32.mrb[4].mxu1 }
 0x228   : > { %v1432_v45 = vadd.f32 %v2134_v59, %v1892_v14  ;;  %v1356_v34 = vpop.f32.mrb[5].mxu1 }
 0x229   : > { %v1430_v61 = vadd.f32 %v1892_v14, %v1356_v34  ;;  %v2135_v10 = vpop.f32.mrb[6].mxu1  ;;  %2160 = vmatprep.mubr.bf16.mxu0 %v1458_v39 }
 0x22a   : > { %v1433_v60 = vadd.f32 %v2135_v10, %v1892_v14  ;;  %v1359_v32 = vpop.f32.mrb[7].mxu1  ;;  %2161 = vmatmul.mubr.bf16.vlgmr.msra.gmra.mrb[16].mxu0 %v1459_v36  ;;  %v1448_v22 = vmax.f32 %v1432_v45, 0.0  ;;  %v2256_v36 = vld [vmem:[%s2331_s13] sm:$0xff] }
 0x22b   : > { %v1431_v8 = vadd.f32 %v1892_v14, %v1359_v32  ;;  %v1446_v12 = vmax.f32 %v1430_v61, 0.0  ;;  %v2257_v61 = vld [vmem:[%s2331_s13 + $0x8] sm:$0xff] }
 0x22c   : > { %v1449_v46 = vmax.f32 %v1433_v60, 0.0 }
 0x22d   : > { %v1447_v21 = vmax.f32 %v1431_v8, 0.0 }
 0x22e   : > { %v1461_v4 = vpack.c.bf16 %v1449_v46, %v1448_v22 }
 0x22f   : > { %v1460_v27 = vpack.c.bf16 %v1447_v21, %v1446_v12  ;;  %v2138_v15 = vpop.f32.mrb[8].mxu1 }
 0x230   : > { %v1436_v37 = vadd.f32 %v2138_v15, %v1892_v14  ;;  %v1372_v43 = vpop.f32.mrb[9].mxu1 }
 0x231   : > { %v1434_v5 = vadd.f32 %v1892_v14, %v1372_v43  ;;  %v2139_v9 = vpop.f32.mrb[10].mxu1  ;;  %2164 = vmatprep.mubr.bf16.mxu0 %v1460_v27 }
 0x232   : > { %v1437_v57 = vadd.f32 %v2139_v9, %v1892_v14  ;;  %v1375_v6 = vpop.f32.mrb[11].mxu1  ;;  %2165 = vmatmul.mubr.bf16.gmra.mrb[20].mxu0 %v1461_v4  ;;  %v1452_v55 = vmax.f32 %v1436_v37, 0.0 }
 0x233   : > { %v1435_v38 = vadd.f32 %v1892_v14, %v1375_v6  ;;  %v1450_v20 = vmax.f32 %v1434_v5, 0.0 }
 0x234   : > { %v1453_v50 = vmax.f32 %v1437_v57, 0.0 }
 0x235   : > { %v1451_v53 = vmax.f32 %v1435_v38, 0.0 }
 0x236   : > { %v1463_v2 = vpack.c.bf16 %v1453_v50, %v1452_v55 }
 0x237   : > { %v1462_v33 = vpack.c.bf16 %v1451_v53, %v1450_v20  ;;  %v2142_v41 = vpop.f32.mrb[12].mxu1 }
 0x238   : > { %v1440_v44 = vadd.f32 %v2142_v41, %v1892_v14  ;;  %v1388_v49 = vpop.f32.mrb[13].mxu1 }
 0x239   : > { %v1438_v13 = vadd.f32 %v1892_v14, %v1388_v49  ;;  %v2143_v51 = vpop.f32.mrb[14].mxu1  ;;  %2168 = vmatprep.mubr.bf16.mxu0 %v1462_v33 }
 0x23a   : > { %v1441_v40 = vadd.f32 %v2143_v51, %v1892_v14  ;;  %v1391_v62 = vpop.f32.mrb[15].mxu1  ;;  %2169 = vmatmul.mubr.bf16.gmra.mrb[24].mxu0 %v1463_v2  ;;  %v1456_v52 = vmax.f32 %v1440_v44, 0.0 }
 0x23b   : > { %v1439_v3 = vadd.f32 %v1892_v14, %v1391_v62  ;;  %v1454_v58 = vmax.f32 %v1438_v13, 0.0 }
 0x23c   : > { %v1457_v63 = vmax.f32 %v1441_v40, 0.0 }
 0x23d   : > { %v1455_v54 = vmax.f32 %v1439_v3, 0.0 }
 0x23e   : > { %v1465_v0 = vpack.c.bf16 %v1457_v63, %v1456_v52 }
 0x23f   : > { %v1464_v11 = vpack.c.bf16 %v1455_v54, %v1454_v58  ;;  %v3038_v58 = vld [vmem:[#allocation2_spill] sm:$0xff] }
 0x241   : > { %2172 = vmatprep.mubr.bf16.mxu0 %v1464_v11 }
 0x242   : > { %2173 = vmatmul.mubr.bf16.gmra.mrb[28].mxu0 %v1465_v0 }
 0x2fd   : > { %v2162_v42 = vpop.f32.mrb[16].mxu0 }
 0x2fe   : > { %v1580_v56 = vadd.f32 %v2162_v42, %v2915_v7  ;;  %v1571_v14 = vpop.f32.mrb[17].mxu0  ;;  %v3039_v42 = vld [vmem:[#allocation4_spill] sm:$0xff] }
 0x2ff   : > { %v1572_v1 = vadd.f32 %v2915_v7, %v1571_v14  ;;  %v2163_v47 = vpop.f32.mrb[18].mxu0 }
 0x300   : > { %v1636_v31 = vadd.f32 %v1580_v56, %v2366_v16  ;;  %v1583_v28 = vadd.f32 %v2163_v47, %v2915_v7  ;;  %v1574_v48 = vpop.f32.mrb[19].mxu0 }
 0x301   : > { %v1634_v39 = vadd.f32 %v2256_v36, %v1572_v1  ;;  %v1575_v59 = vadd.f32 %v2915_v7, %v1574_v48  ;;  %v3040_v1 = vld [vmem:[#allocation3_spill] sm:$0xff] }
 0x302   : > { %v1652_v45 = vmax.f32 %v1636_v31, 0.0  ;;  %v1637_v16 = vadd.f32 %v1583_v28, %v2369_v17 }
 0x303   : > { %v1650_v34 = vmax.f32 %v1634_v39, 0.0  ;;  %v1635_v10 = vadd.f32 %v2257_v61, %v1575_v59 }
 0x304   : > { %1668 = vst [vmem:[%s2926_s20 + $0x10] sm:$0xff] %v1652_v45  ;;  %v1653_v60 = vmax.f32 %v1637_v16, 0.0 }
 0x305   : > { %1666 = vst [vmem:[%s2926_s20] sm:$0xff] %v1650_v34  ;;  %v1651_v32 = vmax.f32 %v1635_v10, 0.0  ;;  %v2166_v8 = vpop.f32.mrb[20].mxu0 }
 0x306   : > { %1669 = vst [vmem:[%s2926_s20 + $0x18] sm:$0xff] %v1653_v60  ;;  %v1596_v22 = vadd.f32 %v2166_v8, %v2915_v7  ;;  %v1587_v46 = vpop.f32.mrb[21].mxu0 }
 0x307   : > { %1667 = vst [vmem:[%s2926_s20 + $0x8] sm:$0xff] %v1651_v32  ;;  %v1588_v12 = vadd.f32 %v2915_v7, %v1587_v46  ;;  %v2167_v21 = vpop.f32.mrb[22].mxu0 }
 0x308   : > { %v1640_v17 = vadd.f32 %v1596_v22, %v2385_v23  ;;  %v1599_v4 = vadd.f32 %v2167_v21, %v2915_v7  ;;  %v1590_v27 = vpop.f32.mrb[23].mxu0 }
 0x309   : > { %v1638_v15 = vadd.f32 %v1588_v12, %v2372_v18  ;;  %v1591_v37 = vadd.f32 %v2915_v7, %v1590_v27 }
 0x30a   : > { %v1656_v43 = vmax.f32 %v1640_v17, 0.0  ;;  %v1641_v5 = vadd.f32 %v1599_v4, %v2388_v24 }
 0x30b   : > { %v1654_v9 = vmax.f32 %v1638_v15, 0.0  ;;  %v1639_v57 = vadd.f32 %v1591_v37, %v2375_v19 }
 0x30c   : > { %1672 = vst [vmem:[%s2926_s20 + $0x30] sm:$0xff] %v1656_v43  ;;  %v1657_v6 = vmax.f32 %v1641_v5, 0.0 }
 0x30d   : > { %1670 = vst [vmem:[%s2926_s20 + $0x20] sm:$0xff] %v1654_v9  ;;  %v1655_v38 = vmax.f32 %v1639_v57, 0.0  ;;  %v2170_v55 = vpop.f32.mrb[24].mxu0 }
 0x30e   : > { %1673 = vst [vmem:[%s2926_s20 + $0x38] sm:$0xff] %v1657_v6  ;;  %v1612_v23 = vadd.f32 %v2170_v55, %v2915_v7  ;;  %v1603_v50 = vpop.f32.mrb[25].mxu0 }
 0x30f   : > { %1671 = vst [vmem:[%s2926_s20 + $0x28] sm:$0xff] %v1655_v38  ;;  %v1604_v18 = vadd.f32 %v2915_v7, %v1603_v50  ;;  %v2171_v20 = vpop.f32.mrb[26].mxu0 }
 0x310   : > { %v1644_v24 = vadd.f32 %v1612_v23, %v2401_v29  ;;  %v1615_v19 = vadd.f32 %v2171_v20, %v2915_v7  ;;  %v1606_v53 = vpop.f32.mrb[27].mxu0 }
 0x311   : > { %v1642_v2 = vadd.f32 %v1604_v18, %v2391_v25  ;;  %v1607_v33 = vadd.f32 %v2915_v7, %v1606_v53 }
 0x312   : > { %v1660_v41 = vmax.f32 %v1644_v24, 0.0  ;;  %v1645_v44 = vadd.f32 %v1615_v19, %v2404_v30 }
 0x313   : > { %v1658_v49 = vmax.f32 %v1642_v2, 0.0  ;;  %v1643_v13 = vadd.f32 %v1607_v33, %v2394_v26 }
 0x314   : > { %1676 = vst [vmem:[%s2926_s20 + $0x50] sm:$0xff] %v1660_v41  ;;  %v1661_v51 = vmax.f32 %v1645_v44, 0.0 }
 0x315   : > { %1674 = vst [vmem:[%s2926_s20 + $0x40] sm:$0xff] %v1658_v49  ;;  %v1659_v40 = vmax.f32 %v1643_v13, 0.0  ;;  %v2174_v62 = vpop.f32.mrb[28].mxu0 }
 0x316   : > { %1677 = vst [vmem:[%s2926_s20 + $0x58] sm:$0xff] %v1661_v51  ;;  %v1628_v29 = vadd.f32 %v2174_v62, %v2915_v7  ;;  %v1619_v3 = vpop.f32.mrb[29].mxu0 }
 0x317   : > { %1675 = vst [vmem:[%s2926_s20 + $0x48] sm:$0xff] %v1659_v40  ;;  %v1620_v25 = vadd.f32 %v2915_v7, %v1619_v3  ;;  %v2175_v30 = vpop.f32.mrb[30].mxu0 }
 0x318   : > { %v1648_v52 = vadd.f32 %v1628_v29, %v2417_v35  ;;  %v1631_v26 = vadd.f32 %v2175_v30, %v2915_v7  ;;  %v1622_v63 = vpop.f32.mrb[31].mxu0 }
 0x319   : > { %v1646_v54 = vadd.f32 %v1620_v25, %v3038_v58  ;;  %v1623_v0 = vadd.f32 %v2915_v7, %v1622_v63 }
 0x31a   : > { %v1664_v11 = vmax.f32 %v1648_v52, 0.0  ;;  %v1649_v56 = vadd.f32 %v1631_v26, %v3039_v42 }
 0x31b   : > { %v1662_v14 = vmax.f32 %v1646_v54, 0.0  ;;  %v1647_v47 = vadd.f32 %v1623_v0, %v3040_v1 }
 0x31c   : > { %1680 = vst [vmem:[%s2926_s20 + $0x70] sm:$0xff] %v1664_v11  ;;  %v1665_v31 = vmax.f32 %v1649_v56, 0.0 }
 0x31d   : > { %1678 = vst [vmem:[%s2926_s20 + $0x60] sm:$0xff] %v1662_v14  ;;  %v1663_v28 = vmax.f32 %v1647_v47, 0.0 }
 0x31e   : > { %1681 = vst [vmem:[%s2926_s20 + $0x78] sm:$0xff] %v1665_v31 }
 0x31f   : > { %1679 = vst [vmem:[%s2926_s20 + $0x68] sm:$0xff] %v1663_v28 }
 0x320 PF: > { %s17_s24 = sadd.s32 1, %s2264_s24  }
 0x321   : > { %p14_p4 = scmp.ge.s32.totalorder %s17_s24, 4  }
 0x323   :  { %16 = sbr.rel (!%p14_p4) target bundleno = 1 (0x1), region = 80 }

</bundles_post_ra>
